<compile_context>
chip_gen: v6e
topology: v6e:2x2x1
jax: 0.10.0
libtpu: 0.0.40
codegen_flags: <defaults>
</compile_context>

<pallas_src>
import functools

import jax
import jax.numpy as jnp
import numpy as np
from jax import lax
from jax.experimental import pallas as pl
from jax.experimental.pallas import tpu as pltpu

_LANE = 128      # activation starts at a lane-tile boundary inside the scratch
_EPS = 1e-5


# ----------------------------------------------------------------------------
# Fused kernel: num_layers ResnetBlock1d + ConvTranspose1d, one batch element
# ----------------------------------------------------------------------------
def _fused_upsample_block_kernel(
    x_ref, pg_ref,
    g1_ref, be1_ref, w1_ref, b1_ref,
    g2_ref, be2_ref, w2_ref, b2_ref,
    wup_ref, bup_ref,
    o_ref,
    pad_ref,
    *, num_layers, eps):
  C, L = x_ref.shape[1], x_ref.shape[2]
  OFF = _LANE
  inv_l = 1.0 / L

  # Only the two border columns (OFF-1 and OFF+L) are ever read without having
  # been written first; zero just those two (tiny stores) instead of the whole
  # (C, OFF+L+1) scratch.  Done every grid step so the kernel stays correct
  # even if the parallel batch axis is split across TensorCores (each core has
  # its own, uninitialised scratch instance).
  zero_col = jnp.zeros((C, 1), pad_ref.dtype)
  pad_ref[:, OFF - 1:OFF] = zero_col
  pad_ref[:, OFF + L:OFF + L + 1] = zero_col

  pg = pg_ref[...]                            # (C, C) f32 group-pooling matrix
  v = x_ref[0].astype(jnp.float32)            # (C, L) running activation (f32)

  def gn_silu(u, gamma, beta):
    # GroupNorm + SiLU on a (C, L) f32 tile.  Per-channel E[x] and E[x^2] via
    # lane (XLU) reduces, pooled to per-group stats with ONE tiny (C,C)@(C,2)
    # MXU matmul (one-pass variance).  Stats stay in f32.
    s = jnp.concatenate(
        [jnp.sum(u, axis=1, keepdims=True),
         jnp.sum(u * u, axis=1, keepdims=True)], axis=1) * inv_l
    g = jnp.dot(pg, s, preferred_element_type=jnp.float32)        # (C, 2)
    mean = g[:, 0:1]
    var = g[:, 1:2] - mean * mean
    h = (u - mean) * lax.rsqrt(var + eps) * gamma + beta
    return h * jax.nn.sigmoid(h)              # SiLU

  def stack3(u):
    # Build [x_{l-1}; x_l; x_{l+1}] as a (3C, L) bf16 operand: one aligned
    # bf16 store into the zero-bordered scratch, then shifted reads (no
    # O(L^2) shift matmuls).
    pad_ref[:, OFF:OFF + L] = u.astype(pad_ref.dtype)
    return jnp.concatenate(
        [pad_ref[:, OFF - 1:OFF - 1 + L],
         pad_ref[:, OFF:OFF + L],
         pad_ref[:, OFF + 1:OFF + 1 + L]], axis=0)

  def conv3(u, w_cat, bias):
    # Single fused MXU matmul with a 3*C contraction, bf16 operands, f32 acc.
    return jnp.dot(w_cat, stack3(u), preferred_element_type=jnp.float32) + bias

  for n in range(num_layers):                 # static unroll over layers
    h = conv3(gn_silu(v, g1_ref[n], be1_ref[n]), w1_ref[n], b1_ref[n])
    h = conv3(gn_silu(h, g2_ref[n], be2_ref[n]), w2_ref[n], b2_ref[n])
    v = h + v                                 # to_out == Identity (Cin == Cout)

  # ConvTranspose1d, phase-decomposed: out[:, f*j + r] = phase_r weights @
  # [x_{j-1}; x_j; x_{j+1}], one matmul producing all f phases at once.
  f = o_ref.shape[1]
  cout = o_ref.shape[2]
  y = jnp.dot(wup_ref[...], stack3(v),
              preferred_element_type=jnp.float32) + bup_ref[...]   # (f*cout, L)
  # One full-block store (free leading-dim reshape when Cout % 8 == 0) instead
  # of f partial sub-block stores.
  o_ref[0] = y.reshape(f, cout, L).astype(o_ref.dtype)


def _const_spec(a):
  """Full-array, grid-constant input.

  Single-buffered (pl.Buffered(1)): the index_map never changes, so the
  default double-buffer would just waste VMEM (matters most on v7x's 64 MiB).
  Falls back to a plain BlockSpec on jax versions without pipeline_mode.
  """
  n = a.ndim
  idx = lambda b: (0,) * n
  try:
    return pl.BlockSpec(a.shape, idx, pipeline_mode=pl.Buffered(1))
  except Exception:
    return pl.BlockSpec(a.shape, idx)


@functools.partial(jax.jit, static_argnames=("factor", "num_layers", "eps"))
def upsample_block_forward(x, kp, *, factor, num_layers, eps=_EPS):
  B, C, L = x.shape
  f = factor
  Cout = kp["w_up"].shape[0] // f

  out_ph = pl.pallas_call(
      functools.partial(_fused_upsample_block_kernel,
                        num_layers=num_layers, eps=eps),
      out_shape=jax.ShapeDtypeStruct((B, f, Cout, L), x.dtype),
      grid=(B,),
      in_specs=[pl.BlockSpec((1, C, L), lambda b: (b, 0, 0)),
                _const_spec(kp["p_gn"]),
                _const_spec(kp["gn1_g"]), _const_spec(kp["gn1_b"]),
                _const_spec(kp["w1"]), _const_spec(kp["b1"]),
                _const_spec(kp["gn2_g"]), _const_spec(kp["gn2_b"]),
                _const_spec(kp["w2"]), _const_spec(kp["b2"]),
                _const_spec(kp["w_up"]), _const_spec(kp["b_up"])],
      out_specs=pl.BlockSpec((1, f, Cout, L), lambda b: (b, 0, 0, 0)),
      scratch_shapes=[pltpu.VMEM((C, _LANE + L + 1), jnp.bfloat16)],
      compiler_params=pltpu.CompilerParams(
          dimension_semantics=("parallel",),
          # Raise when scaling C/L up (resident activation + weights strategy);
          # keep within v7x's 64 MiB physical VMEM.
          vmem_limit_bytes=32 * 1024 * 1024),
  )(x, kp["p_gn"],
    kp["gn1_g"], kp["gn1_b"], kp["w1"], kp["b1"],
    kp["gn2_g"], kp["gn2_b"], kp["w2"], kp["b2"],
    kp["w_up"], kp["b_up"])

  # Phase-to-length interleave: (B, f, Cout, L) -> (B, Cout, L*f).
  # TODO(synk): fold this into the kernel once Mosaic supports lane-strided
  # stores (stride on the minormost dim must currently be 1), which would make
  # the output fully lane-dense and drop this epilogue.
  return jnp.transpose(out_ph, (0, 2, 3, 1)).reshape(B, Cout, L * f)


# TODO(synk): attention/cross-attention branch (use_attention=True), skip
# concatenation, time/class conditioning, and the factor==1 / use_nearest
# upsample variants are disabled in this config and not implemented as kernels.


# ----------------------------------------------------------------------------
# Host-side parameter preparation (PyTorch layouts -> fused kernel layouts)
# ----------------------------------------------------------------------------
def prepare_kernel_params(raw_blocks, raw_up, *, num_groups, factor):
  C = raw_blocks[0]["gn1_g"].shape[0]
  cg = C // num_groups
  grp = np.arange(C) // cg
  p_gn = jnp.asarray((grp[:, None] == grp[None, :]).astype(np.float32) / cg)

  def cat_w(w):   # (Cout, Cin, 3) -> (Cout, 3*Cin), tap-major, bf16 MXU operand
    co, ci, k = w.shape
    return jnp.transpose(w, (0, 2, 1)).reshape(co, k * ci).astype(jnp.bfloat16)

  def col(a):
    return a.reshape(-1, 1)

  kp = {
      "p_gn": p_gn,
      "gn1_g": jnp.stack([col(rb["gn1_g"]) for rb in raw_blocks]),
      "gn1_b": jnp.stack([col(rb["gn1_b"]) for rb in raw_blocks]),
      "w1": jnp.stack([cat_w(rb["w1"]) for rb in raw_blocks]),
      "b1": jnp.stack([col(rb["b1"]) for rb in raw_blocks]),
      "gn2_g": jnp.stack([col(rb["gn2_g"]) for rb in raw_blocks]),
      "gn2_b": jnp.stack([col(rb["gn2_b"]) for rb in raw_blocks]),
      "w2": jnp.stack([cat_w(rb["w2"]) for rb in raw_blocks]),
      "b2": jnp.stack([col(rb["b2"]) for rb in raw_blocks]),
  }

  # ConvTranspose1d(k=2f, stride=f, padding=f//2+f%2, output_padding=f%2),
  # re-expressed per output phase r in [0, f):
  #   out[:, f*j + r] = sum_{taps k hitting phase r} W_k @ x[:, j - d],
  # with d in {-1, 0, +1} mapping to the [x_{j-1}; x_j; x_{j+1}] blocks.
  w_pt, b_pt = raw_up["w"], raw_up["b"]          # (Cin, Cout, K), (Cout,)
  Cin, Cout, K = w_pt.shape
  f = factor
  p = f // 2 + f % 2
  w_np = np.zeros((f * Cout, 3 * Cin), np.float32)
  w_src = np.asarray(w_pt)
  for k in range(K):
    r = (k - p) % f
    d = (k - p - r) // f                         # in {-1, 0, +1}
    blk = 1 - d                                  # 0: x_{j-1}, 1: x_j, 2: x_{j+1}
    w_np[r * Cout:(r + 1) * Cout, blk * Cin:(blk + 1) * Cin] += w_src[:, :, k].T
  kp["w_up"] = jnp.asarray(w_np).astype(jnp.bfloat16)
  kp["b_up"] = jnp.tile(jnp.reshape(b_pt, (Cout, 1)), (f, 1))
  return kp


# ----------------------------------------------------------------------------
# Pure-JAX reference (independent formulation) for correctness checking
# ----------------------------------------------------------------------------
def ref_groupnorm(x, g, b, G, eps=_EPS):
  B, C, L = x.shape
  xr = x.reshape(B, G, C // G, L)
  mean = xr.mean(axis=(2, 3), keepdims=True)
  var = ((xr - mean) ** 2).mean(axis=(2, 3), keepdims=True)
  xn = ((xr - mean) / jnp.sqrt(var + eps)).reshape(B, C, L)
  return xn * g[None, :, None] + b[None, :, None]


def ref_conv1d_k3(x, w, b):
  B, C, L = x.shape
  xp = jnp.pad(x, ((0, 0), (0, 0), (1, 1)))
  out = (jnp.einsum('oc,bcl->bol', w[:, :, 0], xp[:, :, 0:L])
         + jnp.einsum('oc,bcl->bol', w[:, :, 1], xp[:, :, 1:L + 1])
         + jnp.einsum('oc,bcl->bol', w[:, :, 2], xp[:, :, 2:L + 2]))
  return out + b[None, :, None]


def ref_conv_transpose1d(x, w, b, stride, padding, output_padding):
  B, Cin, L = x.shape
  _, Cout, K = w.shape
  Lfull = (L - 1) * stride + K
  out_full = jnp.zeros((B, Cout, Lfull), x.dtype)
  for k in range(K):
    yk = jnp.einsum('bcl,co->bol', x, w[:, :, k])
    out_full = out_full.at[:, :, k:k + (L - 1) * stride + 1:stride].add(yk)
  Lout = (L - 1) * stride - 2 * padding + K + output_padding
  return out_full[:, :, padding:padding + Lout] + b[None, :, None]


def ref_resnet_block(x, raw, G):
  h = ref_conv1d_k3(jax.nn.silu(ref_groupnorm(x, raw["gn1_g"], raw["gn1_b"], G)),
                    raw["w1"], raw["b1"])
  h = ref_conv1d_k3(jax.nn.silu(ref_groupnorm(h, raw["gn2_g"], raw["gn2_b"], G)),
                    raw["w2"], raw["b2"])
  return h + x


def ref_forward(x, raw_blocks, raw_up, G, factor):
  for raw in raw_blocks:
    x = ref_resnet_block(x, raw, G)
  return ref_conv_transpose1d(x, raw_up["w"], raw_up["b"], stride=factor,
                              padding=factor // 2 + factor % 2,
                              output_padding=factor % 2)


# ----------------------------------------------------------------------------
# Deterministic parameter construction (PyTorch layouts)
# ----------------------------------------------------------------------------
def make_params(key, in_channels, out_channels, num_layers, factor):
  C = in_channels
  raw_blocks = []
  for _ in range(num_layers):
    keys = jax.random.split(key, 9)
    key = keys[0]
    raw_blocks.append({
        "gn1_g": 1.0 + 0.1 * jax.random.normal(keys[1], (C,), jnp.float32),
        "gn1_b": 0.1 * jax.random.normal(keys[2], (C,), jnp.float32),
        "w1": 0.2 * jax.random.normal(keys[3], (C, C, 3), jnp.float32),
        "b1": 0.1 * jax.random.normal(keys[4], (C,), jnp.float32),
        "gn2_g": 1.0 + 0.1 * jax.random.normal(keys[5], (C,), jnp.float32),
        "gn2_b": 0.1 * jax.random.normal(keys[6], (C,), jnp.float32),
        "w2": 0.2 * jax.random.normal(keys[7], (C, C, 3), jnp.float32),
        "b2": 0.1 * jax.random.normal(keys[8], (C,), jnp.float32),
    })
  K = 2 * factor
  k1, k2 = jax.random.split(key)
  raw_up = {
      "w": 0.2 * jax.random.normal(k1, (in_channels, out_channels, K), jnp.float32),
      "b": 0.1 * jax.random.normal(k2, (out_channels,), jnp.float32),
  }
  return raw_blocks, raw_up


# ----------------------------------------------------------------------------
if __name__ == "__main__":
  B, C_IN, C_OUT, L = 2, 8, 16, 16
  NUM_GROUPS, FACTOR, NUM_LAYERS = 4, 2, 2

  key = jax.random.PRNGKey(0)
  kx, kparam = jax.random.split(key)
  x = jax.random.normal(kx, (B, C_IN, L), jnp.float32)   # (batch, channels, length)

  raw_blocks, raw_up = make_params(kparam, C_IN, C_OUT, NUM_LAYERS, FACTOR)
  kparams = prepare_kernel_params(raw_blocks, raw_up,
                                  num_groups=NUM_GROUPS, factor=FACTOR)

  out = upsample_block_forward(x, kparams, factor=FACTOR, num_layers=NUM_LAYERS)
  out = jax.block_until_ready(out)

  ref = ref_forward(x, raw_blocks, raw_up, NUM_GROUPS, FACTOR)
  ref = jax.block_until_ready(ref)

  assert out.shape == (B, C_OUT, FACTOR * L), (out.shape, (B, C_OUT, FACTOR * L))
  # bf16 MXU operands (f32 accumulation) -> relaxed tolerance vs f32 reference.
  np.testing.assert_allclose(np.asarray(out), np.asarray(ref), rtol=5e-2, atol=5e-2)
  print("KERNEL_OK")
</pallas_src>

<mosaic_0001>
module attributes {stable_mosaic.version = 11 : i64} {
  func.func @_fused_upsample_block_kernel(%arg0: i32, %arg1: memref<1x8x16xf32, #tpu.memory_space<vmem>>, %arg2: memref<8x8xf32, #tpu.memory_space<vmem>>, %arg3: memref<2x8x1xf32, #tpu.memory_space<vmem>>, %arg4: memref<2x8x1xf32, #tpu.memory_space<vmem>>, %arg5: memref<2x8x24xbf16, #tpu.memory_space<vmem>>, %arg6: memref<2x8x1xf32, #tpu.memory_space<vmem>>, %arg7: memref<2x8x1xf32, #tpu.memory_space<vmem>>, %arg8: memref<2x8x1xf32, #tpu.memory_space<vmem>>, %arg9: memref<2x8x24xbf16, #tpu.memory_space<vmem>>, %arg10: memref<2x8x1xf32, #tpu.memory_space<vmem>>, %arg11: memref<32x24xbf16, #tpu.memory_space<vmem>>, %arg12: memref<32x1xf32, #tpu.memory_space<vmem>>, %arg13: memref<1x2x16x16xf32, #tpu.memory_space<vmem>>, %arg14: memref<8x145xbf16, #tpu.memory_space<vmem>>) attributes {dimension_semantics = [#tpu.dimension_semantics<parallel>], iteration_bounds = array<i64: 2>, scalar_prefetch = 0 : i64, scratch_operands = 1 : i64, tpu.core_type = #tpu.core_type<tc>, window_params = [{transform_indices = @transform_0, window_bounds = array<i64: 1, 8, 16>}, {pipeline_mode = #tpu.pipeline_mode<synchronous>, transform_indices = @transform_1, window_bounds = array<i64: 8, 8>}, {pipeline_mode = #tpu.pipeline_mode<synchronous>, transform_indices = @transform_2, window_bounds = array<i64: 2, 8, 1>}, {pipeline_mode = #tpu.pipeline_mode<synchronous>, transform_indices = @transform_3, window_bounds = array<i64: 2, 8, 1>}, {pipeline_mode = #tpu.pipeline_mode<synchronous>, transform_indices = @transform_4, window_bounds = array<i64: 2, 8, 24>}, {pipeline_mode = #tpu.pipeline_mode<synchronous>, transform_indices = @transform_5, window_bounds = array<i64: 2, 8, 1>}, {pipeline_mode = #tpu.pipeline_mode<synchronous>, transform_indices = @transform_6, window_bounds = array<i64: 2, 8, 1>}, {pipeline_mode = #tpu.pipeline_mode<synchronous>, transform_indices = @transform_7, window_bounds = array<i64: 2, 8, 1>}, {pipeline_mode = #tpu.pipeline_mode<synchronous>, transform_indices = @transform_8, window_bounds = array<i64: 2, 8, 24>}, {pipeline_mode = #tpu.pipeline_mode<synchronous>, transform_indices = @transform_9, window_bounds = array<i64: 2, 8, 1>}, {pipeline_mode = #tpu.pipeline_mode<synchronous>, transform_indices = @transform_10, window_bounds = array<i64: 32, 24>}, {pipeline_mode = #tpu.pipeline_mode<synchronous>, transform_indices = @transform_11, window_bounds = array<i64: 32, 1>}, {transform_indices = @transform_12, window_bounds = array<i64: 1, 2, 16, 16>}]} {
    %cst = arith.constant 0.000000e+00 : bf16
    %0 = vector.broadcast %cst : bf16 to vector<8x1xbf16>
    %c0 = arith.constant 0 : index
    %c127 = arith.constant 127 : index
    %1 = vector.load %arg14[%c0, %c127] : memref<8x145xbf16, #tpu.memory_space<vmem>>, vector<8x1xbf16>
    tpu.vector_store %arg14[%c0, %c127], %0 {strides = array<i32>} : memref<8x145xbf16, #tpu.memory_space<vmem>>, vector<8x1xbf16>,
    %c0_0 = arith.constant 0 : index
    %c144 = arith.constant 144 : index
    %2 = vector.load %arg14[%c0_0, %c144] : memref<8x145xbf16, #tpu.memory_space<vmem>>, vector<8x1xbf16>
    tpu.vector_store %arg14[%c0_0, %c144], %0 {strides = array<i32>} : memref<8x145xbf16, #tpu.memory_space<vmem>>, vector<8x1xbf16>,
    %c0_1 = arith.constant 0 : index
    %c0_2 = arith.constant 0 : index
    %3 = vector.load %arg2[%c0_1, %c0_2] : memref<8x8xf32, #tpu.memory_space<vmem>>, vector<8x8xf32>
    %c0_3 = arith.constant 0 : index
    %c0_4 = arith.constant 0 : index
    %c0_5 = arith.constant 0 : index
    %4 = vector.load %arg1[%c0_3, %c0_4, %c0_5] : memref<1x8x16xf32, #tpu.memory_space<vmem>>, vector<1x8x16xf32>
    %5 = vector.shape_cast %4 : vector<1x8x16xf32> to vector<8x16xf32>
    %c0_6 = arith.constant 0 : index
    %c0_7 = arith.constant 0 : index
    %c0_8 = arith.constant 0 : index
    %6 = vector.load %arg3[%c0_6, %c0_7, %c0_8] : memref<2x8x1xf32, #tpu.memory_space<vmem>>, vector<1x8x1xf32>
    %7 = vector.shape_cast %6 : vector<1x8x1xf32> to vector<8x1xf32>
    %c0_9 = arith.constant 0 : index
    %c0_10 = arith.constant 0 : index
    %c0_11 = arith.constant 0 : index
    %8 = vector.load %arg4[%c0_9, %c0_10, %c0_11] : memref<2x8x1xf32, #tpu.memory_space<vmem>>, vector<1x8x1xf32>
    %9 = vector.shape_cast %8 : vector<1x8x1xf32> to vector<8x1xf32>
    %cst_12 = arith.constant dense<0.000000e+00> : vector<8xf32>
    %10 = vector.multi_reduction <add>, %5, %cst_12 [1] : vector<8x16xf32> to vector<8xf32>
    %11 = vector.shape_cast %10 : vector<8xf32> to vector<8x1xf32>
    %12 = arith.mulf %5, %5 : vector<8x16xf32>
    %cst_13 = arith.constant dense<0.000000e+00> : vector<8xf32>
    %13 = vector.multi_reduction <add>, %12, %cst_13 [1] : vector<8x16xf32> to vector<8xf32>
    %14 = vector.shape_cast %13 : vector<8xf32> to vector<8x1xf32>
    %15 = tpu.concatenate %11, %14 in 1 : vector<8x1xf32>, vector<8x1xf32> -> vector<8x2xf32>
    %cst_14 = arith.constant 6.250000e-02 : f32
    %16 = vector.broadcast %cst_14 : f32 to vector<8x2xf32>
    %17 = arith.mulf %15, %16 : vector<8x2xf32>
    %cst_15 = arith.constant dense<0.000000e+00> : vector<8x2xf32>
    %18 = tpu.matmul %3, %17, %cst_15 {dimension_numbers = #tpu.dot_dimension_numbers<[1], [0], [0], [1], [0, 0, 1, 1], [], []>} : vector<8x8xf32>, vector<8x2xf32>, vector<8x2xf32> -> vector<8x2xf32>
    %19 = vector.extract_strided_slice %18 {offsets = [0, 0], sizes = [8, 1], strides = [1, 1]} : vector<8x2xf32> to vector<8x1xf32>
    %20 = vector.extract_strided_slice %18 {offsets = [0, 1], sizes = [8, 1], strides = [1, 1]} : vector<8x2xf32> to vector<8x1xf32>
    %21 = arith.mulf %19, %19 : vector<8x1xf32>
    %22 = arith.subf %20, %21 : vector<8x1xf32>
    %23 = vector.broadcast %19 : vector<8x1xf32> to vector<8x16xf32>
    %24 = arith.subf %5, %23 : vector<8x16xf32>
    %cst_16 = arith.constant 9.99999974E-6 : f32
    %25 = vector.broadcast %cst_16 : f32 to vector<8x1xf32>
    %26 = arith.addf %22, %25 : vector<8x1xf32>
    %27 = math.rsqrt %26 : vector<8x1xf32>
    %28 = vector.broadcast %27 : vector<8x1xf32> to vector<8x16xf32>
    %29 = arith.mulf %24, %28 : vector<8x16xf32>
    %30 = vector.broadcast %7 : vector<8x1xf32> to vector<8x16xf32>
    %31 = arith.mulf %29, %30 : vector<8x16xf32>
    %32 = vector.broadcast %9 : vector<8x1xf32> to vector<8x16xf32>
    %33 = arith.addf %31, %32 : vector<8x16xf32>
    %34 = arith.negf %33 : vector<8x16xf32>
    %35 = math.exp %34 : vector<8x16xf32>
    %cst_17 = arith.constant 1.000000e+00 : f32
    %36 = vector.broadcast %cst_17 : f32 to vector<8x16xf32>
    %37 = arith.addf %36, %35 : vector<8x16xf32>
    %38 = arith.divf %36, %37 : vector<8x16xf32>
    %39 = arith.mulf %33, %38 : vector<8x16xf32>
    %c0_18 = arith.constant 0 : index
    %c0_19 = arith.constant 0 : index
    %c0_20 = arith.constant 0 : index
    %40 = vector.load %arg5[%c0_18, %c0_19, %c0_20] : memref<2x8x24xbf16, #tpu.memory_space<vmem>>, vector<1x8x24xbf16>
    %41 = vector.shape_cast %40 : vector<1x8x24xbf16> to vector<8x24xbf16>
    %c0_21 = arith.constant 0 : index
    %c0_22 = arith.constant 0 : index
    %c0_23 = arith.constant 0 : index
    %42 = vector.load %arg6[%c0_21, %c0_22, %c0_23] : memref<2x8x1xf32, #tpu.memory_space<vmem>>, vector<1x8x1xf32>
    %43 = vector.shape_cast %42 : vector<1x8x1xf32> to vector<8x1xf32>
    %44 = arith.truncf %39 : vector<8x16xf32> to vector<8x16xbf16>
    %c0_24 = arith.constant 0 : index
    %c128 = arith.constant 128 : index
    %45 = vector.load %arg14[%c0_24, %c128] : memref<8x145xbf16, #tpu.memory_space<vmem>>, vector<8x16xbf16>
    tpu.vector_store %arg14[%c0_24, %c128], %44 {strides = array<i32>} : memref<8x145xbf16, #tpu.memory_space<vmem>>, vector<8x16xbf16>,
    %c0_25 = arith.constant 0 : index
    %c127_26 = arith.constant 127 : index
    %46 = vector.load %arg14[%c0_25, %c127_26] : memref<8x145xbf16, #tpu.memory_space<vmem>>, vector<8x16xbf16>
    %c0_27 = arith.constant 0 : index
    %c128_28 = arith.constant 128 : index
    %47 = vector.load %arg14[%c0_27, %c128_28] : memref<8x145xbf16, #tpu.memory_space<vmem>>, vector<8x16xbf16>
    %c0_29 = arith.constant 0 : index
    %c129 = arith.constant 129 : index
    %48 = vector.load %arg14[%c0_29, %c129] : memref<8x145xbf16, #tpu.memory_space<vmem>>, vector<8x16xbf16>
    %49 = tpu.concatenate %46, %47, %48 in 0 : vector<8x16xbf16>, vector<8x16xbf16>, vector<8x16xbf16> -> vector<24x16xbf16>
    %cst_30 = arith.constant dense<0.000000e+00> : vector<8x16xf32>
    %50 = tpu.matmul %41, %49, %cst_30 {dimension_numbers = #tpu.dot_dimension_numbers<[1], [0], [0], [1], [0, 0, 1, 1], [], []>} : vector<8x24xbf16>, vector<24x16xbf16>, vector<8x16xf32> -> vector<8x16xf32>
    %51 = vector.broadcast %43 : vector<8x1xf32> to vector<8x16xf32>
    %52 = arith.addf %50, %51 : vector<8x16xf32>
    %c0_31 = arith.constant 0 : index
    %c0_32 = arith.constant 0 : index
    %c0_33 = arith.constant 0 : index
    %53 = vector.load %arg7[%c0_31, %c0_32, %c0_33] : memref<2x8x1xf32, #tpu.memory_space<vmem>>, vector<1x8x1xf32>
    %54 = vector.shape_cast %53 : vector<1x8x1xf32> to vector<8x1xf32>
    %c0_34 = arith.constant 0 : index
    %c0_35 = arith.constant 0 : index
    %c0_36 = arith.constant 0 : index
    %55 = vector.load %arg8[%c0_34, %c0_35, %c0_36] : memref<2x8x1xf32, #tpu.memory_space<vmem>>, vector<1x8x1xf32>
    %56 = vector.shape_cast %55 : vector<1x8x1xf32> to vector<8x1xf32>
    %cst_37 = arith.constant dense<0.000000e+00> : vector<8xf32>
    %57 = vector.multi_reduction <add>, %52, %cst_37 [1] : vector<8x16xf32> to vector<8xf32>
    %58 = vector.shape_cast %57 : vector<8xf32> to vector<8x1xf32>
    %59 = arith.mulf %52, %52 : vector<8x16xf32>
    %cst_38 = arith.constant dense<0.000000e+00> : vector<8xf32>
    %60 = vector.multi_reduction <add>, %59, %cst_38 [1] : vector<8x16xf32> to vector<8xf32>
    %61 = vector.shape_cast %60 : vector<8xf32> to vector<8x1xf32>
    %62 = tpu.concatenate %58, %61 in 1 : vector<8x1xf32>, vector<8x1xf32> -> vector<8x2xf32>
    %cst_39 = arith.constant 6.250000e-02 : f32
    %63 = vector.broadcast %cst_39 : f32 to vector<8x2xf32>
    %64 = arith.mulf %62, %63 : vector<8x2xf32>
    %cst_40 = arith.constant dense<0.000000e+00> : vector<8x2xf32>
    %65 = tpu.matmul %3, %64, %cst_40 {dimension_numbers = #tpu.dot_dimension_numbers<[1], [0], [0], [1], [0, 0, 1, 1], [], []>} : vector<8x8xf32>, vector<8x2xf32>, vector<8x2xf32> -> vector<8x2xf32>
    %66 = vector.extract_strided_slice %65 {offsets = [0, 0], sizes = [8, 1], strides = [1, 1]} : vector<8x2xf32> to vector<8x1xf32>
    %67 = vector.extract_strided_slice %65 {offsets = [0, 1], sizes = [8, 1], strides = [1, 1]} : vector<8x2xf32> to vector<8x1xf32>
    %68 = arith.mulf %66, %66 : vector<8x1xf32>
    %69 = arith.subf %67, %68 : vector<8x1xf32>
    %70 = vector.broadcast %66 : vector<8x1xf32> to vector<8x16xf32>
    %71 = arith.subf %52, %70 : vector<8x16xf32>
    %cst_41 = arith.constant 9.99999974E-6 : f32
    %72 = vector.broadcast %cst_41 : f32 to vector<8x1xf32>
    %73 = arith.addf %69, %72 : vector<8x1xf32>
    %74 = math.rsqrt %73 : vector<8x1xf32>
    %75 = vector.broadcast %74 : vector<8x1xf32> to vector<8x16xf32>
    %76 = arith.mulf %71, %75 : vector<8x16xf32>
    %77 = vector.broadcast %54 : vector<8x1xf32> to vector<8x16xf32>
    %78 = arith.mulf %76, %77 : vector<8x16xf32>
    %79 = vector.broadcast %56 : vector<8x1xf32> to vector<8x16xf32>
    %80 = arith.addf %78, %79 : vector<8x16xf32>
    %81 = arith.negf %80 : vector<8x16xf32>
    %82 = math.exp %81 : vector<8x16xf32>
    %cst_42 = arith.constant 1.000000e+00 : f32
    %83 = vector.broadcast %cst_42 : f32 to vector<8x16xf32>
    %84 = arith.addf %83, %82 : vector<8x16xf32>
    %85 = arith.divf %83, %84 : vector<8x16xf32>
    %86 = arith.mulf %80, %85 : vector<8x16xf32>
    %c0_43 = arith.constant 0 : index
    %c0_44 = arith.constant 0 : index
    %c0_45 = arith.constant 0 : index
    %87 = vector.load %arg9[%c0_43, %c0_44, %c0_45] : memref<2x8x24xbf16, #tpu.memory_space<vmem>>, vector<1x8x24xbf16>
    %88 = vector.shape_cast %87 : vector<1x8x24xbf16> to vector<8x24xbf16>
    %c0_46 = arith.constant 0 : index
    %c0_47 = arith.constant 0 : index
    %c0_48 = arith.constant 0 : index
    %89 = vector.load %arg10[%c0_46, %c0_47, %c0_48] : memref<2x8x1xf32, #tpu.memory_space<vmem>>, vector<1x8x1xf32>
    %90 = vector.shape_cast %89 : vector<1x8x1xf32> to vector<8x1xf32>
    %91 = arith.truncf %86 : vector<8x16xf32> to vector<8x16xbf16>
    %c0_49 = arith.constant 0 : index
    %c128_50 = arith.constant 128 : index
    %92 = vector.load %arg14[%c0_49, %c128_50] : memref<8x145xbf16, #tpu.memory_space<vmem>>, vector<8x16xbf16>
    tpu.vector_store %arg14[%c0_49, %c128_50], %91 {strides = array<i32>} : memref<8x145xbf16, #tpu.memory_space<vmem>>, vector<8x16xbf16>,
    %c0_51 = arith.constant 0 : index
    %c127_52 = arith.constant 127 : index
    %93 = vector.load %arg14[%c0_51, %c127_52] : memref<8x145xbf16, #tpu.memory_space<vmem>>, vector<8x16xbf16>
    %c0_53 = arith.constant 0 : index
    %c128_54 = arith.constant 128 : index
    %94 = vector.load %arg14[%c0_53, %c128_54] : memref<8x145xbf16, #tpu.memory_space<vmem>>, vector<8x16xbf16>
    %c0_55 = arith.constant 0 : index
    %c129_56 = arith.constant 129 : index
    %95 = vector.load %arg14[%c0_55, %c129_56] : memref<8x145xbf16, #tpu.memory_space<vmem>>, vector<8x16xbf16>
    %96 = tpu.concatenate %93, %94, %95 in 0 : vector<8x16xbf16>, vector<8x16xbf16>, vector<8x16xbf16> -> vector<24x16xbf16>
    %cst_57 = arith.constant dense<0.000000e+00> : vector<8x16xf32>
    %97 = tpu.matmul %88, %96, %cst_57 {dimension_numbers = #tpu.dot_dimension_numbers<[1], [0], [0], [1], [0, 0, 1, 1], [], []>} : vector<8x24xbf16>, vector<24x16xbf16>, vector<8x16xf32> -> vector<8x16xf32>
    %98 = vector.broadcast %90 : vector<8x1xf32> to vector<8x16xf32>
    %99 = arith.addf %97, %98 : vector<8x16xf32>
    %100 = arith.addf %99, %5 : vector<8x16xf32>
    %c1 = arith.constant 1 : index
    %c0_58 = arith.constant 0 : index
    %c0_59 = arith.constant 0 : index
    %101 = vector.load %arg3[%c1, %c0_58, %c0_59] : memref<2x8x1xf32, #tpu.memory_space<vmem>>, vector<1x8x1xf32>
    %102 = vector.shape_cast %101 : vector<1x8x1xf32> to vector<8x1xf32>
    %c1_60 = arith.constant 1 : index
    %c0_61 = arith.constant 0 : index
    %c0_62 = arith.constant 0 : index
    %103 = vector.load %arg4[%c1_60, %c0_61, %c0_62] : memref<2x8x1xf32, #tpu.memory_space<vmem>>, vector<1x8x1xf32>
    %104 = vector.shape_cast %103 : vector<1x8x1xf32> to vector<8x1xf32>
    %cst_63 = arith.constant dense<0.000000e+00> : vector<8xf32>
    %105 = vector.multi_reduction <add>, %100, %cst_63 [1] : vector<8x16xf32> to vector<8xf32>
    %106 = vector.shape_cast %105 : vector<8xf32> to vector<8x1xf32>
    %107 = arith.mulf %100, %100 : vector<8x16xf32>
    %cst_64 = arith.constant dense<0.000000e+00> : vector<8xf32>
    %108 = vector.multi_reduction <add>, %107, %cst_64 [1] : vector<8x16xf32> to vector<8xf32>
    %109 = vector.shape_cast %108 : vector<8xf32> to vector<8x1xf32>
    %110 = tpu.concatenate %106, %109 in 1 : vector<8x1xf32>, vector<8x1xf32> -> vector<8x2xf32>
    %cst_65 = arith.constant 6.250000e-02 : f32
    %111 = vector.broadcast %cst_65 : f32 to vector<8x2xf32>
    %112 = arith.mulf %110, %111 : vector<8x2xf32>
    %cst_66 = arith.constant dense<0.000000e+00> : vector<8x2xf32>
    %113 = tpu.matmul %3, %112, %cst_66 {dimension_numbers = #tpu.dot_dimension_numbers<[1], [0], [0], [1], [0, 0, 1, 1], [], []>} : vector<8x8xf32>, vector<8x2xf32>, vector<8x2xf32> -> vector<8x2xf32>
    %114 = vector.extract_strided_slice %113 {offsets = [0, 0], sizes = [8, 1], strides = [1, 1]} : vector<8x2xf32> to vector<8x1xf32>
    %115 = vector.extract_strided_slice %113 {offsets = [0, 1], sizes = [8, 1], strides = [1, 1]} : vector<8x2xf32> to vector<8x1xf32>
    %116 = arith.mulf %114, %114 : vector<8x1xf32>
    %117 = arith.subf %115, %116 : vector<8x1xf32>
    %118 = vector.broadcast %114 : vector<8x1xf32> to vector<8x16xf32>
    %119 = arith.subf %100, %118 : vector<8x16xf32>
    %cst_67 = arith.constant 9.99999974E-6 : f32
    %120 = vector.broadcast %cst_67 : f32 to vector<8x1xf32>
    %121 = arith.addf %117, %120 : vector<8x1xf32>
    %122 = math.rsqrt %121 : vector<8x1xf32>
    %123 = vector.broadcast %122 : vector<8x1xf32> to vector<8x16xf32>
    %124 = arith.mulf %119, %123 : vector<8x16xf32>
    %125 = vector.broadcast %102 : vector<8x1xf32> to vector<8x16xf32>
    %126 = arith.mulf %124, %125 : vector<8x16xf32>
    %127 = vector.broadcast %104 : vector<8x1xf32> to vector<8x16xf32>
    %128 = arith.addf %126, %127 : vector<8x16xf32>
    %129 = arith.negf %128 : vector<8x16xf32>
    %130 = math.exp %129 : vector<8x16xf32>
    %cst_68 = arith.constant 1.000000e+00 : f32
    %131 = vector.broadcast %cst_68 : f32 to vector<8x16xf32>
    %132 = arith.addf %131, %130 : vector<8x16xf32>
    %133 = arith.divf %131, %132 : vector<8x16xf32>
    %134 = arith.mulf %128, %133 : vector<8x16xf32>
    %c1_69 = arith.constant 1 : index
    %c0_70 = arith.constant 0 : index
    %c0_71 = arith.constant 0 : index
    %135 = vector.load %arg5[%c1_69, %c0_70, %c0_71] : memref<2x8x24xbf16, #tpu.memory_space<vmem>>, vector<1x8x24xbf16>
    %136 = vector.shape_cast %135 : vector<1x8x24xbf16> to vector<8x24xbf16>
    %c1_72 = arith.constant 1 : index
    %c0_73 = arith.constant 0 : index
    %c0_74 = arith.constant 0 : index
    %137 = vector.load %arg6[%c1_72, %c0_73, %c0_74] : memref<2x8x1xf32, #tpu.memory_space<vmem>>, vector<1x8x1xf32>
    %138 = vector.shape_cast %137 : vector<1x8x1xf32> to vector<8x1xf32>
    %139 = arith.truncf %134 : vector<8x16xf32> to vector<8x16xbf16>
    %c0_75 = arith.constant 0 : index
    %c128_76 = arith.constant 128 : index
    %140 = vector.load %arg14[%c0_75, %c128_76] : memref<8x145xbf16, #tpu.memory_space<vmem>>, vector<8x16xbf16>
    tpu.vector_store %arg14[%c0_75, %c128_76], %139 {strides = array<i32>} : memref<8x145xbf16, #tpu.memory_space<vmem>>, vector<8x16xbf16>,
    %c0_77 = arith.constant 0 : index
    %c127_78 = arith.constant 127 : index
    %141 = vector.load %arg14[%c0_77, %c127_78] : memref<8x145xbf16, #tpu.memory_space<vmem>>, vector<8x16xbf16>
    %c0_79 = arith.constant 0 : index
    %c128_80 = arith.constant 128 : index
    %142 = vector.load %arg14[%c0_79, %c128_80] : memref<8x145xbf16, #tpu.memory_space<vmem>>, vector<8x16xbf16>
    %c0_81 = arith.constant 0 : index
    %c129_82 = arith.constant 129 : index
    %143 = vector.load %arg14[%c0_81, %c129_82] : memref<8x145xbf16, #tpu.memory_space<vmem>>, vector<8x16xbf16>
    %144 = tpu.concatenate %141, %142, %143 in 0 : vector<8x16xbf16>, vector<8x16xbf16>, vector<8x16xbf16> -> vector<24x16xbf16>
    %cst_83 = arith.constant dense<0.000000e+00> : vector<8x16xf32>
    %145 = tpu.matmul %136, %144, %cst_83 {dimension_numbers = #tpu.dot_dimension_numbers<[1], [0], [0], [1], [0, 0, 1, 1], [], []>} : vector<8x24xbf16>, vector<24x16xbf16>, vector<8x16xf32> -> vector<8x16xf32>
    %146 = vector.broadcast %138 : vector<8x1xf32> to vector<8x16xf32>
    %147 = arith.addf %145, %146 : vector<8x16xf32>
    %c1_84 = arith.constant 1 : index
    %c0_85 = arith.constant 0 : index
    %c0_86 = arith.constant 0 : index
    %148 = vector.load %arg7[%c1_84, %c0_85, %c0_86] : memref<2x8x1xf32, #tpu.memory_space<vmem>>, vector<1x8x1xf32>
    %149 = vector.shape_cast %148 : vector<1x8x1xf32> to vector<8x1xf32>
    %c1_87 = arith.constant 1 : index
    %c0_88 = arith.constant 0 : index
    %c0_89 = arith.constant 0 : index
    %150 = vector.load %arg8[%c1_87, %c0_88, %c0_89] : memref<2x8x1xf32, #tpu.memory_space<vmem>>, vector<1x8x1xf32>
    %151 = vector.shape_cast %150 : vector<1x8x1xf32> to vector<8x1xf32>
    %cst_90 = arith.constant dense<0.000000e+00> : vector<8xf32>
    %152 = vector.multi_reduction <add>, %147, %cst_90 [1] : vector<8x16xf32> to vector<8xf32>
    %153 = vector.shape_cast %152 : vector<8xf32> to vector<8x1xf32>
    %154 = arith.mulf %147, %147 : vector<8x16xf32>
    %cst_91 = arith.constant dense<0.000000e+00> : vector<8xf32>
    %155 = vector.multi_reduction <add>, %154, %cst_91 [1] : vector<8x16xf32> to vector<8xf32>
    %156 = vector.shape_cast %155 : vector<8xf32> to vector<8x1xf32>
    %157 = tpu.concatenate %153, %156 in 1 : vector<8x1xf32>, vector<8x1xf32> -> vector<8x2xf32>
    %cst_92 = arith.constant 6.250000e-02 : f32
    %158 = vector.broadcast %cst_92 : f32 to vector<8x2xf32>
    %159 = arith.mulf %157, %158 : vector<8x2xf32>
    %cst_93 = arith.constant dense<0.000000e+00> : vector<8x2xf32>
    %160 = tpu.matmul %3, %159, %cst_93 {dimension_numbers = #tpu.dot_dimension_numbers<[1], [0], [0], [1], [0, 0, 1, 1], [], []>} : vector<8x8xf32>, vector<8x2xf32>, vector<8x2xf32> -> vector<8x2xf32>
    %161 = vector.extract_strided_slice %160 {offsets = [0, 0], sizes = [8, 1], strides = [1, 1]} : vector<8x2xf32> to vector<8x1xf32>
    %162 = vector.extract_strided_slice %160 {offsets = [0, 1], sizes = [8, 1], strides = [1, 1]} : vector<8x2xf32> to vector<8x1xf32>
    %163 = arith.mulf %161, %161 : vector<8x1xf32>
    %164 = arith.subf %162, %163 : vector<8x1xf32>
    %165 = vector.broadcast %161 : vector<8x1xf32> to vector<8x16xf32>
    %166 = arith.subf %147, %165 : vector<8x16xf32>
    %cst_94 = arith.constant 9.99999974E-6 : f32
    %167 = vector.broadcast %cst_94 : f32 to vector<8x1xf32>
    %168 = arith.addf %164, %167 : vector<8x1xf32>
    %169 = math.rsqrt %168 : vector<8x1xf32>
    %170 = vector.broadcast %169 : vector<8x1xf32> to vector<8x16xf32>
    %171 = arith.mulf %166, %170 : vector<8x16xf32>
    %172 = vector.broadcast %149 : vector<8x1xf32> to vector<8x16xf32>
    %173 = arith.mulf %171, %172 : vector<8x16xf32>
    %174 = vector.broadcast %151 : vector<8x1xf32> to vector<8x16xf32>
    %175 = arith.addf %173, %174 : vector<8x16xf32>
    %176 = arith.negf %175 : vector<8x16xf32>
    %177 = math.exp %176 : vector<8x16xf32>
    %cst_95 = arith.constant 1.000000e+00 : f32
    %178 = vector.broadcast %cst_95 : f32 to vector<8x16xf32>
    %179 = arith.addf %178, %177 : vector<8x16xf32>
    %180 = arith.divf %178, %179 : vector<8x16xf32>
    %181 = arith.mulf %175, %180 : vector<8x16xf32>
    %c1_96 = arith.constant 1 : index
    %c0_97 = arith.constant 0 : index
    %c0_98 = arith.constant 0 : index
    %182 = vector.load %arg9[%c1_96, %c0_97, %c0_98] : memref<2x8x24xbf16, #tpu.memory_space<vmem>>, vector<1x8x24xbf16>
    %183 = vector.shape_cast %182 : vector<1x8x24xbf16> to vector<8x24xbf16>
    %c1_99 = arith.constant 1 : index
    %c0_100 = arith.constant 0 : index
    %c0_101 = arith.constant 0 : index
    %184 = vector.load %arg10[%c1_99, %c0_100, %c0_101] : memref<2x8x1xf32, #tpu.memory_space<vmem>>, vector<1x8x1xf32>
    %185 = vector.shape_cast %184 : vector<1x8x1xf32> to vector<8x1xf32>
    %186 = arith.truncf %181 : vector<8x16xf32> to vector<8x16xbf16>
    %c0_102 = arith.constant 0 : index
    %c128_103 = arith.constant 128 : index
    %187 = vector.load %arg14[%c0_102, %c128_103] : memref<8x145xbf16, #tpu.memory_space<vmem>>, vector<8x16xbf16>
    tpu.vector_store %arg14[%c0_102, %c128_103], %186 {strides = array<i32>} : memref<8x145xbf16, #tpu.memory_space<vmem>>, vector<8x16xbf16>,
    %c0_104 = arith.constant 0 : index
    %c127_105 = arith.constant 127 : index
    %188 = vector.load %arg14[%c0_104, %c127_105] : memref<8x145xbf16, #tpu.memory_space<vmem>>, vector<8x16xbf16>
    %c0_106 = arith.constant 0 : index
    %c128_107 = arith.constant 128 : index
    %189 = vector.load %arg14[%c0_106, %c128_107] : memref<8x145xbf16, #tpu.memory_space<vmem>>, vector<8x16xbf16>
    %c0_108 = arith.constant 0 : index
    %c129_109 = arith.constant 129 : index
    %190 = vector.load %arg14[%c0_108, %c129_109] : memref<8x145xbf16, #tpu.memory_space<vmem>>, vector<8x16xbf16>
    %191 = tpu.concatenate %188, %189, %190 in 0 : vector<8x16xbf16>, vector<8x16xbf16>, vector<8x16xbf16> -> vector<24x16xbf16>
    %cst_110 = arith.constant dense<0.000000e+00> : vector<8x16xf32>
    %192 = tpu.matmul %183, %191, %cst_110 {dimension_numbers = #tpu.dot_dimension_numbers<[1], [0], [0], [1], [0, 0, 1, 1], [], []>} : vector<8x24xbf16>, vector<24x16xbf16>, vector<8x16xf32> -> vector<8x16xf32>
    %193 = vector.broadcast %185 : vector<8x1xf32> to vector<8x16xf32>
    %194 = arith.addf %192, %193 : vector<8x16xf32>
    %195 = arith.addf %194, %100 : vector<8x16xf32>
    %c0_111 = arith.constant 0 : index
    %c0_112 = arith.constant 0 : index
    %196 = vector.load %arg11[%c0_111, %c0_112] : memref<32x24xbf16, #tpu.memory_space<vmem>>, vector<32x24xbf16>
    %197 = arith.truncf %195 : vector<8x16xf32> to vector<8x16xbf16>
    %c0_113 = arith.constant 0 : index
    %c128_114 = arith.constant 128 : index
    %198 = vector.load %arg14[%c0_113, %c128_114] : memref<8x145xbf16, #tpu.memory_space<vmem>>, vector<8x16xbf16>
    tpu.vector_store %arg14[%c0_113, %c128_114], %197 {strides = array<i32>} : memref<8x145xbf16, #tpu.memory_space<vmem>>, vector<8x16xbf16>,
    %c0_115 = arith.constant 0 : index
    %c127_116 = arith.constant 127 : index
    %199 = vector.load %arg14[%c0_115, %c127_116] : memref<8x145xbf16, #tpu.memory_space<vmem>>, vector<8x16xbf16>
    %c0_117 = arith.constant 0 : index
    %c128_118 = arith.constant 128 : index
    %200 = vector.load %arg14[%c0_117, %c128_118] : memref<8x145xbf16, #tpu.memory_space<vmem>>, vector<8x16xbf16>
    %c0_119 = arith.constant 0 : index
    %c129_120 = arith.constant 129 : index
    %201 = vector.load %arg14[%c0_119, %c129_120] : memref<8x145xbf16, #tpu.memory_space<vmem>>, vector<8x16xbf16>
    %202 = tpu.concatenate %199, %200, %201 in 0 : vector<8x16xbf16>, vector<8x16xbf16>, vector<8x16xbf16> -> vector<24x16xbf16>
    %cst_121 = arith.constant dense<0.000000e+00> : vector<32x16xf32>
    %203 = tpu.matmul %196, %202, %cst_121 {dimension_numbers = #tpu.dot_dimension_numbers<[1], [0], [0], [1], [0, 0, 1, 1], [], []>} : vector<32x24xbf16>, vector<24x16xbf16>, vector<32x16xf32> -> vector<32x16xf32>
    %c0_122 = arith.constant 0 : index
    %c0_123 = arith.constant 0 : index
    %204 = vector.load %arg12[%c0_122, %c0_123] : memref<32x1xf32, #tpu.memory_space<vmem>>, vector<32x1xf32>
    %205 = vector.broadcast %204 : vector<32x1xf32> to vector<32x16xf32>
    %206 = arith.addf %203, %205 : vector<32x16xf32>
    %207 = vector.shape_cast %206 : vector<32x16xf32> to vector<2x16x16xf32>
    %c0_124 = arith.constant 0 : index
    %c0_125 = arith.constant 0 : index
    %c0_126 = arith.constant 0 : index
    %c0_127 = arith.constant 0 : index
    %208 = vector.load %arg13[%c0_124, %c0_125, %c0_126, %c0_127] : memref<1x2x16x16xf32, #tpu.memory_space<vmem>>, vector<1x2x16x16xf32>
    %209 = vector.shape_cast %208 : vector<1x2x16x16xf32> to vector<2x16x16xf32>
    %210 = vector.shape_cast %207 : vector<2x16x16xf32> to vector<1x2x16x16xf32>
    tpu.vector_store %arg13[%c0_124, %c0_125, %c0_126, %c0_127], %210 {strides = array<i32>} : memref<1x2x16x16xf32, #tpu.memory_space<vmem>>, vector<1x2x16x16xf32>,
    return
  }
  func.func @transform_0(%arg0: i32) -> (i32, i32, i32) {
    %c0_i32 = arith.constant 0 : i32
    %c0_i32_0 = arith.constant 0 : i32
    %c0_i32_1 = arith.constant 0 : i32
    return %arg0, %c0_i32, %c0_i32_0 : i32, i32, i32
  }
  func.func @transform_1(%arg0: i32) -> (i32, i32) {
    %c0_i32 = arith.constant 0 : i32
    %c0_i32_0 = arith.constant 0 : i32
    %c0_i32_1 = arith.constant 0 : i32
    return %c0_i32, %c0_i32_0 : i32, i32
  }
  func.func @transform_2(%arg0: i32) -> (i32, i32, i32) {
    %c0_i32 = arith.constant 0 : i32
    %c0_i32_0 = arith.constant 0 : i32
    %c0_i32_1 = arith.constant 0 : i32
    %c0_i32_2 = arith.constant 0 : i32
    return %c0_i32, %c0_i32_0, %c0_i32_1 : i32, i32, i32
  }
  func.func @transform_3(%arg0: i32) -> (i32, i32, i32) {
    %c0_i32 = arith.constant 0 : i32
    %c0_i32_0 = arith.constant 0 : i32
    %c0_i32_1 = arith.constant 0 : i32
    %c0_i32_2 = arith.constant 0 : i32
    return %c0_i32, %c0_i32_0, %c0_i32_1 : i32, i32, i32
  }
  func.func @transform_4(%arg0: i32) -> (i32, i32, i32) {
    %c0_i32 = arith.constant 0 : i32
    %c0_i32_0 = arith.constant 0 : i32
    %c0_i32_1 = arith.constant 0 : i32
    %c0_i32_2 = arith.constant 0 : i32
    return %c0_i32, %c0_i32_0, %c0_i32_1 : i32, i32, i32
  }
  func.func @transform_5(%arg0: i32) -> (i32, i32, i32) {
    %c0_i32 = arith.constant 0 : i32
    %c0_i32_0 = arith.constant 0 : i32
    %c0_i32_1 = arith.constant 0 : i32
    %c0_i32_2 = arith.constant 0 : i32
    return %c0_i32, %c0_i32_0, %c0_i32_1 : i32, i32, i32
  }
  func.func @transform_6(%arg0: i32) -> (i32, i32, i32) {
    %c0_i32 = arith.constant 0 : i32
    %c0_i32_0 = arith.constant 0 : i32
    %c0_i32_1 = arith.constant 0 : i32
    %c0_i32_2 = arith.constant 0 : i32
    return %c0_i32, %c0_i32_0, %c0_i32_1 : i32, i32, i32
  }
  func.func @transform_7(%arg0: i32) -> (i32, i32, i32) {
    %c0_i32 = arith.constant 0 : i32
    %c0_i32_0 = arith.constant 0 : i32
    %c0_i32_1 = arith.constant 0 : i32
    %c0_i32_2 = arith.constant 0 : i32
    return %c0_i32, %c0_i32_0, %c0_i32_1 : i32, i32, i32
  }
  func.func @transform_8(%arg0: i32) -> (i32, i32, i32) {
    %c0_i32 = arith.constant 0 : i32
    %c0_i32_0 = arith.constant 0 : i32
    %c0_i32_1 = arith.constant 0 : i32
    %c0_i32_2 = arith.constant 0 : i32
    return %c0_i32, %c0_i32_0, %c0_i32_1 : i32, i32, i32
  }
  func.func @transform_9(%arg0: i32) -> (i32, i32, i32) {
    %c0_i32 = arith.constant 0 : i32
    %c0_i32_0 = arith.constant 0 : i32
    %c0_i32_1 = arith.constant 0 : i32
    %c0_i32_2 = arith.constant 0 : i32
    return %c0_i32, %c0_i32_0, %c0_i32_1 : i32, i32, i32
  }
  func.func @transform_10(%arg0: i32) -> (i32, i32) {
    %c0_i32 = arith.constant 0 : i32
    %c0_i32_0 = arith.constant 0 : i32
    %c0_i32_1 = arith.constant 0 : i32
    return %c0_i32, %c0_i32_0 : i32, i32
  }
  func.func @transform_11(%arg0: i32) -> (i32, i32) {
    %c0_i32 = arith.constant 0 : i32
    %c0_i32_0 = arith.constant 0 : i32
    %c0_i32_1 = arith.constant 0 : i32
    return %c0_i32, %c0_i32_0 : i32, i32
  }
  func.func @transform_12(%arg0: i32) -> (i32, i32, i32, i32) {
    %c0_i32 = arith.constant 0 : i32
    %c0_i32_0 = arith.constant 0 : i32
    %c0_i32_1 = arith.constant 0 : i32
    %c0_i32_2 = arith.constant 0 : i32
    return %arg0, %c0_i32, %c0_i32_0, %c0_i32_1 : i32, i32, i32, i32
  }
}

</mosaic_0001>

<bundles_post_ra>
// kernel: upsample_block_forward.1
= control target key start
LH: loop header
LB: loop body
LE: loop exit
PB: predicated region body
PF: predicated region fallthrough
CT: control target
= control target key end

     0   :  { %s1718_s21 = smov 0   ;;  %s1946_s0 = inlined_call_operand.vmem [shape: f32[2,8,16], index: 0, kind: input, shape index: {}]   ;;  %s1947_s1 = inlined_call_operand.vmem [shape: f32[8,8], index: 1, kind: input, shape index: {}]   ;;  %s1948_s2 = inlined_call_operand.vmem [shape: f32[2,8,1], index: 2, kind: input, shape index: {}]   ;;  %s1949_s3 = inlined_call_operand.vmem [shape: f32[2,8,1], index: 3, kind: input, shape index: {}]   ;;  %s1950_s4 = inlined_call_operand.vmem [shape: bf16[2,8,24], index: 4, kind: input, shape index: {}]   ;;  %s1951_s5 = inlined_call_operand.vmem [shape: f32[2,8,1], index: 5, kind: input, shape index: {}]   ;;  %s1952_s6 = inlined_call_operand.vmem [shape: f32[2,8,1], index: 6, kind: input, shape index: {}]   ;;  %s1953_s7 = inlined_call_operand.vmem [shape: f32[2,8,1], index: 7, kind: input, shape index: {}]   ;;  %s1954_s8 = inlined_call_operand.vmem [shape: bf16[2,8,24], index: 8, kind: input, shape index: {}]   ;;  %s1955_s9 = inlined_call_operand.vmem [shape: f32[2,8,1], index: 9, kind: input, shape index: {}]   ;;  %s1956_s10 = inlined_call_operand.vmem [shape: bf16[32,24], index: 10, kind: input, shape index: {}]   ;;  %s1957_s11 = inlined_call_operand.vmem [shape: f32[32,1], index: 11, kind: input, shape index: {}]   ;;  %s1958_s12 = inlined_call_operand.vmem [shape: f32[2,2,16,16], index: 12, kind: output, shape index: {}]  }
   0x1 LB: > { %s1440_s22 = sadd.s32 4294967295, %s1644_s21   ;;  %p1444_p0 = scmp.ge.s32.totalorder %s1644_s21, 1  ;;  %s1644_s21 = sphi %s1718_s21, %s22_s21  }
   0x2   : > { %p361_p1 = scmp.lt.s32.totalorder %s1644_s21, 3 }
   0x4   : > { %p362_p2 = pnand %p1444_p0, %p361_p1 }
   0x5   : > { %p402_p3 = scmp.lt.s32.totalorder (!%p362_p2), %s1440_s22, 1  ;;  %s1649_s29 = smov (!%p362_p2), 1  }
   0x6   : > { %365 = sbr.rel (%p362_p2) target bundleno = 4805 (0x12c5), region = 68  ;;  %s1651_s16 = smov (!%p362_p2), 126  }
   0x7   : > { %s1652_s17 = smov (!%p362_p2), 127  }
   0xb   : > { %s1960_s22 = smov (!%p402_p3, %s1440_s22), 1  ;;  %vm420_vm0 = vcmask 130048   ;;  %v1646_v4 = vmov 0.0   ;;  %vm1647_vm1 = vmmov 0   ;;  %vm428_vm2 = vcmask 7168   ;;  %v1749_v9 = vld [vmem:[%s1947_s1] sm:$0xff] }
   0xc   : > { %s1445_s23 = sshll.u32 %s1960_s22, 3  ;;  %1514 = vmatprep.subr.mxu0 %v1646_v4  ;;  %1519 = vmatprep.subr.bf16.mxu1 %v1646_v4  ;;  %vm431_vm3 = vcmask 64512   ;;  %vm412_vm4 = vcmask 1044472   ;;  %v1648_v10 = vmov 0   ;;  %v1650_v14 = vmov 1   ;;  %v418_v15 = vld [vmem:[%s1948_s2] sm:$0xff] }
   0xd   : > { %s405_s26 = scalar_lea.vmem %s1946_s0, %s1445_s23  ;;  %1516 = vmatprep.mubr.msk.f32.mxu0 %vm1647_vm1, %v1646_v4  ;;  %1523 = vmatprep.mubr.msk.bf16.mxu1 %vm1647_vm1, %v1646_v4  ;;  %413 = vst.msk [vmem:[#allocation2] sm:$0xf] %vm412_vm4, %v1648_v10  ;;  %vm414_vm5 = vcmask 134272   ;;  %v419_v16 = vld [vmem:[%s1949_s3] sm:$0xff]  ;;  %vm547_vm6 = vcmask 125952   ;;  %vm563_vm7 = vcmask 1043456  }
   0xe   : > { %v1732_v0 = vld [vmem:[%s405_s26] sm:$0xff]  ;;  %1590 = vset.pattern.permute.xlu1 %v1648_v10  ;;  %1591 = vset.pattern.permute.xlu0 %v1650_v14  ;;  %415 = vst.msk [vmem:[#allocation2 + $0x4] sm:$0xf] %vm414_vm5, %v1648_v10  ;;  %vm585_vm8 = vcmask 195584   ;;  %s1489_s14 = sshll.u32 %s1960_s22, 5 }
   0xf   : > { %v421_v1 = vsel %vm420_vm0, %v1732_v0, 0.0  ;;  %v424_v2 = vmul.f32 %v1732_v0, %v1732_v0  ;;  %v545_v43 = vld [vmem:[%s1951_s5] sm:$0xff]  ;;  %s410_s19 = scalar_lea.vmem %s1958_s12, %s1489_s14 }
  0x10   : > { %422 = vadd.xlane.f32.xlu0 %v421_v1  ;;  %v544_v49 = vld [vmem:[%s1950_s4] sm:$0xf] }
  0x11   : > { %v425_v3 = vsel %vm420_vm0, %v424_v2, 0.0 }
  0x14   : > { %426 = vadd.xlane.f32.xlu0 %v425_v3  ;;  %v632_v3 = vld [vmem:[%s1952_s6] sm:$0xff] }
  0x99   : > { %v423_v5 = vpop.xlane.xlu0 %422 }
  0x9d   : > { %v427_v6 = vpop.xlane.xlu0 %426 }
  0x9e   : > { %v429_v7 = vsel %vm428_vm2, %v423_v5, %v427_v6 }
  0x9f   : > { %v430_v8 = vmul.f32 0.0625, %v429_v7 }
  0xa1   : > { %1515 = vmatpush3.msra.mxu0 %v430_v8 }
  0xa2   : > { %1517 = vmatmul.mubr.msk.f32.vlgmr.msra.gmra.mxu0 %vm431_vm3, %v1749_v9  ;;  %1527 = vmatprep.subr.mxu0 %v1646_v4 }
  0xa3   : > { %1529 = vmatprep.mubr.msk.f32.mxu0 %vm1647_vm1, %v1646_v4 }
 0x162   : > { %v501_v11 = vpop.f32.mrf.mxu0 }
 0x163   : > { %v505_v12 = vmul.f32 %v501_v11, %v501_v11 }
 0x164   : > { %v1518_v13 = vpop.f32.mrf.mxu0 }
 0x165   : > { %507 = vrot.lane.b32.xlu1 %v505_v12, %s1649_s29 }
 0x169   : > { %513 = vperm.xlu1 %1590, %v501_v11  }
 0x16d   : > { %527 = vperm.xlu1 %1590, %v418_v15  }
 0x171   : > { %533 = vperm.xlu1 %1590, %v419_v16  }
 0x1d7   : > { %v508_v17 = vpop.permute.xlu1 %507 }
 0x1d8   : > { %v510_v18 = vsub.f32 %v501_v11, %v508_v17  ;;  %v633_v11 = vld [vmem:[%s1953_s7] sm:$0xff] }
 0x1da   : > { %v517_v19 = vadd.f32 1e-05, %v510_v18 }
 0x1dc   : > { %1614 = vrsqrt.f32 %v517_v19 }
 0x1e4   : > { %v514_v21 = vpop.permute.xlu1 %513 }
 0x1e5   : > { %v516_v23 = vsub.f32 %v1732_v0, %v514_v21 }
 0x1e8   : > { %v528_v22 = vpop.permute.xlu1 %527 }
 0x1e9   : > { %v1615_v20 = vpop.eup %1614 }
 0x1ea   : > { %521 = vperm.xlu0 %1591, %v1615_v20  }
 0x1ec   : > { %v534_v27 = vpop.permute.xlu1 %533 }
 0x1ee   : > { %1592 = vset.pattern.permute.xlu0 %v1648_v10 }
 0x265   : > { %v522_v24 = vpop.permute.xlu0 %521 }
 0x266   : > { %v524_v25 = vmul.f32 %v522_v24, %v516_v23 }
 0x268   : > { %v530_v26 = vmul.f32 %v528_v22, %v524_v25 }
 0x26a   : > { %v536_v28 = vadd.f32 %v534_v27, %v530_v26 }
 0x26c   : > { %v1449_v29 = vmul.f32 -1.442695, %v536_v28 }
 0x26e   : > { %1616 = vpow2.f32 %v1449_v29 }
 0x27b   : > { %v1617_v30 = vpop.eup %1616 }
 0x27c   : > { %v540_v31 = vadd.f32 1.0, %v1617_v30 }
 0x27e   : > { %1618 = vrcp.f32 %v540_v31 }
 0x28b   : > { %v1619_v32 = vpop.eup %1618 }
 0x28c   : > { %v543_v33 = vmul.f32 %v1619_v32, %v536_v28 }
 0x28e   : > { %v546_v34 = vpack.c.bf16 %v543_v33, %v543_v33 }
 0x290   : > { %548 = vst.msk [vmem:[#allocation2 + $0x4] sm:$0xf] %vm547_vm6, %v546_v34  ;;  %v753_v34 = vld [vmem:[%s1955_s9] sm:$0xff] }
 0x297   : > { %v1597_v35 = vld [vmem:[#allocation2 + $0x4] ss:$0 sps:$4 sm:$0xff]  }
 0x298   : > { %561 = vrot.lane.b32.xlu1 %v1597_v35, %s1651_s16  ;;  %v549_v37 = vld [vmem:[#allocation2] sm:$0xff] }
 0x299   : > { %v1450_v38 = vcombine.low %v549_v37, %v549_v37  ;;  %v1451_v41 = vcombine.high %v549_v37, %v549_v37 }
 0x29c   : > { %559 = vrot.lane.b32.xlu1 %v1597_v35, %s1652_s17 }
 0x30a   : > { %v562_v36 = vpop.permute.xlu1 %561 }
 0x30b   : > { %580 = vrot.lane.b32.xlu1 %v562_v36, %s1649_s29 }
 0x30e   : > { %v560_v39 = vpop.permute.xlu1 %559 }
 0x30f   : > { %v566_v40 = vsel %vm563_vm7, %v1450_v38, %v560_v39  ;;  %v568_v42 = vsel %vm563_vm7, %v1451_v41, %v560_v39 }
 0x310   : > { %576 = vrot.lane.b32.xlu1 %v566_v40, %s1649_s29  ;;  %v752_v40 = vld [vmem:[%s1954_s8] sm:$0xf] }
 0x314   : > { %578 = vrot.lane.b32.xlu1 %v568_v42, %s1649_s29 }
 0x318   : > { %571 = vperm.xlu1 %1590, %v545_v43  }
 0x37d   : > { %v581_v44 = vpop.permute.xlu1 %580 }
 0x37e   : > { %v590_v45 = vsel %vm563_vm7, %v581_v44, 0 }
 0x37f   : > { %1520 = vmatpush3.bf16.msra.mxu1 %v590_v45 }
 0x380   : > { %1521 = vmatprep.subr.bf16.mxu1 %v1646_v4 }
 0x382   : > { %v577_v46 = vpop.permute.xlu1 %576 }
 0x386   : > { %v579_v47 = vpop.permute.xlu1 %578 }
 0x387   : > { %v583_v48 = vsel %vm428_vm2, %v577_v46, %v579_v47 }
 0x388   : > { %1522 = vmatpush3.bf16.msra.mxu1 %v583_v48 }
 0x389   : > { %1540 = vmatprep.subr.mxu1 %v1646_v4 }
 0x38b   : > { %1524 = vmatmul.mubr.msk.bf16.vlgmr.msra.gmra.mxu1 %vm585_vm8, %v544_v49 }
 0x38c   : > { %1542 = vmatprep.mubr.msk.f32.mxu1 %vm1647_vm1, %v1646_v4 }
 0x393   : > { %v572_v50 = vpop.permute.xlu1 %571 }
 0x44b   : > { %v626_v51 = vpop.f32.mrf.mxu1 }
 0x44c   : > { %v627_v52 = vadd.f32 %v626_v51, %v572_v50 }
 0x44d   : > { %v1525_v53 = vpop.f32.mrf.mxu1 }
 0x44e   : > { %v634_v54 = vsel %vm420_vm0, %v627_v52, 0.0  ;;  %v637_v55 = vmul.f32 %v627_v52, %v627_v52 }
 0x44f   : > { %v629_v56 = vpop.f32.mrf.mxu1  ;;  %635 = vadd.xlane.f32.xlu1 %v634_v54 }
 0x450   : > { %v638_v57 = vsel %vm420_vm0, %v637_v55, 0.0 }
 0x451   : > { %v1526_v58 = vpop.f32.mrf.mxu1  ;;  %639 = vadd.xlane.f32.xlu0 %v638_v57  ;;  %v1460_v57 = vld [vmem:[%s1948_s2 + $0x8] sm:$0xff] }
 0x452   : > { %v1461_v58 = vld [vmem:[%s1949_s3 + $0x8] sm:$0xff] }
 0x4d8   : > { %v636_v59 = vpop.xlane.xlu1 %635 }
 0x4da   : > { %v640_v60 = vpop.xlane.xlu0 %639 }
 0x4db   : > { %v641_v61 = vsel %vm428_vm2, %v636_v59, %v640_v60 }
 0x4dc   : > { %v642_v62 = vmul.f32 0.0625, %v641_v61 }
 0x4de   : > { %1528 = vmatpush3.msra.mxu0 %v642_v62 }
 0x4df   : > { %1530 = vmatmul.mubr.msk.f32.vlgmr.msra.gmra.mxu0 %vm431_vm3, %v1749_v9  ;;  %1532 = vmatprep.subr.bf16.mxu0 %v1646_v4 }
 0x4e0   : > { %1536 = vmatprep.mubr.msk.bf16.mxu0 %vm1647_vm1, %v1646_v4 }
 0x59f   : > { %v709_v63 = vpop.f32.mrf.mxu0 }
 0x5a0   : > { %v713_v1 = vmul.f32 %v709_v63, %v709_v63  ;;  %721 = vperm.xlu0 %1592, %v709_v63  }
 0x5a1   : > { %v1531_v2 = vpop.f32.mrf.mxu0 }
 0x5a2   : > { %715 = vrot.lane.b32.xlu1 %v713_v1, %s1649_s29 }
 0x5a4   : > { %1595 = vset.pattern.permute.xlu0 %v1650_v14 }
 0x5a6   : > { %735 = vperm.xlu1 %1590, %v632_v3  }
 0x5aa   : > { %1593 = vset.pattern.permute.xlu1 %v1650_v14 }
 0x614   : > { %v716_v5 = vpop.permute.xlu1 %715 }
 0x615   : > { %v718_v6 = vsub.f32 %v709_v63, %v716_v5 }
 0x617   : > { %v725_v7 = vadd.f32 1e-05, %v718_v6 }
 0x619   : > { %1620 = vrsqrt.f32 %v725_v7 }
 0x61b   : > { %v722_v12 = vpop.permute.xlu0 %721 }
 0x61c   : > { %v724_v15 = vsub.f32 %v627_v52, %v722_v12 }
 0x621   : > { %v736_v13 = vpop.permute.xlu1 %735 }
 0x626   : > { %v1621_v8 = vpop.eup %1620 }
 0x627   : > { %729 = vperm.xlu1 %1593, %v1621_v8  }
 0x62b   : > { %1594 = vset.pattern.permute.xlu1 %v1648_v10 }
 0x62c   : > { %741 = vperm.xlu1 %1594, %v633_v11  }
 0x6a2   : > { %v730_v16 = vpop.permute.xlu1 %729 }
 0x6a3   : > { %v732_v17 = vmul.f32 %v730_v16, %v724_v15 }
 0x6a5   : > { %v738_v18 = vmul.f32 %v736_v13, %v732_v17 }
 0x6a7   : > { %v742_v14 = vpop.permute.xlu1 %741 }
 0x6a8   : > { %v744_v19 = vadd.f32 %v742_v14, %v738_v18 }
 0x6aa   : > { %v1455_v20 = vmul.f32 -1.442695, %v744_v19 }
 0x6ac   : > { %1622 = vpow2.f32 %v1455_v20 }
 0x6b9   : > { %v1623_v21 = vpop.eup %1622 }
 0x6ba   : > { %v748_v22 = vadd.f32 1.0, %v1623_v21 }
 0x6bc   : > { %1624 = vrcp.f32 %v748_v22 }
 0x6c9   : > { %v1625_v23 = vpop.eup %1624 }
 0x6ca   : > { %v751_v24 = vmul.f32 %v1625_v23, %v744_v19 }
 0x6cc   : > { %v754_v25 = vpack.c.bf16 %v751_v24, %v751_v24  ;;  %v1465_v24 = vld [vmem:[%s1951_s5 + $0x8] sm:$0xff] }
 0x6ce   : > { %755 = vst.msk [vmem:[#allocation2 + $0x4] sm:$0xf] %vm547_vm6, %v754_v25 }
 0x6d5   : > { %v1600_v26 = vld [vmem:[#allocation2 + $0x4] ss:$0 sps:$4 sm:$0xff]  }
 0x6d6   : > { %768 = vrot.lane.b32.xlu1 %v1600_v26, %s1651_s16  ;;  %v756_v28 = vld [vmem:[#allocation2] sm:$0xff] }
 0x6d7   : > { %v1456_v29 = vcombine.low %v756_v28, %v756_v28  ;;  %v1457_v32 = vcombine.high %v756_v28, %v756_v28 }
 0x6da   : > { %766 = vrot.lane.b32.xlu1 %v1600_v26, %s1652_s17 }
 0x748   : > { %v769_v27 = vpop.permute.xlu1 %768 }
 0x749   : > { %786 = vrot.lane.b32.xlu1 %v769_v27, %s1649_s29 }
 0x74c   : > { %v767_v30 = vpop.permute.xlu1 %766 }
 0x74d   : > { %v772_v31 = vsel %vm563_vm7, %v1456_v29, %v767_v30  ;;  %v774_v33 = vsel %vm563_vm7, %v1457_v32, %v767_v30 }
 0x74e   : > { %782 = vrot.lane.b32.xlu1 %v772_v31, %s1649_s29  ;;  %v1464_v31 = vld [vmem:[%s1950_s4 + $0x4] sm:$0xf] }
 0x752   : > { %784 = vrot.lane.b32.xlu1 %v774_v33, %s1649_s29 }
 0x756   : > { %777 = vperm.xlu1 %1594, %v753_v34  }
 0x7bb   : > { %v787_v35 = vpop.permute.xlu1 %786 }
 0x7bc   : > { %v794_v36 = vsel %vm563_vm7, %v787_v35, 0 }
 0x7bd   : > { %1533 = vmatpush3.bf16.msra.mxu0 %v794_v36 }
 0x7be   : > { %1534 = vmatprep.subr.bf16.mxu0 %v1646_v4 }
 0x7c0   : > { %v783_v37 = vpop.permute.xlu1 %782 }
 0x7c4   : > { %v785_v38 = vpop.permute.xlu1 %784 }
 0x7c5   : > { %v788_v39 = vsel %vm428_vm2, %v783_v37, %v785_v38 }
 0x7c6   : > { %1535 = vmatpush3.bf16.msra.mxu0 %v788_v39 }
 0x7c7   : > { %1545 = vmatprep.subr.bf16.mxu0 %v1646_v4 }
 0x7c9   : > { %1537 = vmatmul.mubr.msk.bf16.vlgmr.msra.gmra.mxu0 %vm585_vm8, %v752_v40 }
 0x7ca   : > { %1549 = vmatprep.mubr.msk.bf16.mxu0 %vm1647_vm1, %v1646_v4 }
 0x7d1   : > { %v778_v41 = vpop.permute.xlu1 %777 }
 0x889   : > { %v830_v42 = vpop.f32.mrf.mxu0 }
 0x88a   : > { %v831_v43 = vadd.f32 %v830_v42, %v778_v41 }
 0x88b   : > { %v1538_v44 = vpop.f32.mrf.mxu0 }
 0x88c   : > { %v1830_v45 = vadd.f32 %v831_v43, %v1732_v0 }
 0x88d   : > { %v833_v46 = vpop.f32.mrf.mxu0 }
 0x88e   : > { %v841_v47 = vsel %vm420_vm0, %v1830_v45, 0.0  ;;  %v844_v48 = vmul.f32 %v1830_v45, %v1830_v45 }
 0x88f   : > { %842 = vadd.xlane.f32.xlu0 %v841_v47  ;;  %v1539_v49 = vpop.f32.mrf.mxu0 }
 0x890   : > { %v845_v50 = vsel %vm420_vm0, %v844_v48, 0.0  ;;  %v1470_v48 = vld [vmem:[%s1952_s6 + $0x8] sm:$0xff] }
 0x891   : > { %846 = vadd.xlane.f32.xlu1 %v845_v50 }
 0x918   : > { %v843_v51 = vpop.xlane.xlu0 %842 }
 0x91a   : > { %v847_v52 = vpop.xlane.xlu1 %846 }
 0x91b   : > { %v848_v53 = vsel %vm428_vm2, %v843_v51, %v847_v52 }
 0x91c   : > { %v849_v54 = vmul.f32 0.0625, %v848_v53  ;;  %v1471_v53 = vld [vmem:[%s1953_s7 + $0x8] sm:$0xff] }
 0x91e   : > { %1541 = vmatpush3.msra.mxu1 %v849_v54 }
 0x91f   : > { %1543 = vmatmul.mubr.msk.f32.vlgmr.msra.gmra.mxu1 %vm431_vm3, %v1749_v9  ;;  %1553 = vmatprep.subr.mxu1 %v1646_v4 }
 0x920   : > { %1555 = vmatprep.mubr.msk.f32.mxu1 %vm1647_vm1, %v1646_v4 }
 0x9df   : > { %v916_v0 = vpop.f32.mrf.mxu1 }
 0x9e0   : > { %v920_v55 = vmul.f32 %v916_v0, %v916_v0  ;;  %928 = vperm.xlu1 %1594, %v916_v0  }
 0x9e1   : > { %v1544_v56 = vpop.f32.mrf.mxu1 }
 0x9e2   : > { %922 = vrot.lane.b32.xlu0 %v920_v55, %s1649_s29 }
 0x9e4   : > { %942 = vperm.xlu1 %1594, %v1460_v57  }
 0x9e8   : > { %948 = vperm.xlu1 %1594, %v1461_v58  }
 0xa54   : > { %v923_v59 = vpop.permute.xlu0 %922 }
 0xa55   : > { %v925_v60 = vsub.f32 %v916_v0, %v923_v59 }
 0xa57   : > { %v932_v61 = vadd.f32 1e-05, %v925_v60 }
 0xa59   : > { %1626 = vrsqrt.f32 %v932_v61 }
 0xa5b   : > { %v929_v63 = vpop.permute.xlu1 %928 }
 0xa5c   : > { %v931_v2 = vsub.f32 %v1830_v45, %v929_v63 }
 0xa5f   : > { %v943_v1 = vpop.permute.xlu1 %942 }
 0xa63   : > { %v949_v7 = vpop.permute.xlu1 %948 }
 0xa66   : > { %v1627_v62 = vpop.eup %1626 }
 0xa67   : > { %936 = vperm.xlu0 %1595, %v1627_v62  }
 0xae2   : > { %v937_v3 = vpop.permute.xlu0 %936 }
 0xae3   : > { %v939_v5 = vmul.f32 %v937_v3, %v931_v2 }
 0xae5   : > { %v945_v6 = vmul.f32 %v943_v1, %v939_v5 }
 0xae7   : > { %v951_v8 = vadd.f32 %v949_v7, %v945_v6 }
 0xae9   : > { %v1463_v11 = vmul.f32 -1.442695, %v951_v8 }
 0xaeb   : > { %1628 = vpow2.f32 %v1463_v11 }
 0xaf8   : > { %v1629_v12 = vpop.eup %1628 }
 0xaf9   : > { %v955_v13 = vadd.f32 1.0, %v1629_v12 }
 0xafb   : > { %1630 = vrcp.f32 %v955_v13 }
 0xb08   : > { %v1631_v15 = vpop.eup %1630 }
 0xb09   : > { %v958_v16 = vmul.f32 %v1631_v15, %v951_v8  ;;  %v1475_v15 = vld [vmem:[%s1955_s9 + $0x8] sm:$0xff] }
 0xb0b   : > { %v963_v17 = vpack.c.bf16 %v958_v16, %v958_v16 }
 0xb0d   : > { %964 = vst.msk [vmem:[#allocation2 + $0x4] sm:$0xf] %vm547_vm6, %v963_v17 }
 0xb14   : > { %v1603_v18 = vld [vmem:[#allocation2 + $0x4] ss:$0 sps:$4 sm:$0xff]  }
 0xb15   : > { %975 = vrot.lane.b32.xlu1 %v1603_v18, %s1652_s17  ;;  %977 = vrot.lane.b32.xlu0 %v1603_v18, %s1651_s16  ;;  %v965_v14 = vld [vmem:[#allocation2] sm:$0xff] }
 0xb16   : > { %v1466_v19 = vcombine.low %v965_v14, %v965_v14  ;;  %v1467_v23 = vcombine.high %v965_v14, %v965_v14 }
 0xb87   : > { %v976_v20 = vpop.permute.xlu1 %975  ;;  %v978_v21 = vpop.permute.xlu0 %977 }
 0xb88   : > { %995 = vrot.lane.b32.xlu0 %v978_v21, %s1649_s29  ;;  %v981_v22 = vsel %vm563_vm7, %v1466_v19, %v976_v20  ;;  %v983_v25 = vsel %vm563_vm7, %v1467_v23, %v976_v20  ;;  %v1474_v20 = vld [vmem:[%s1954_s8 + $0x4] sm:$0xf] }
 0xb89   : > { %991 = vrot.lane.b32.xlu1 %v981_v22, %s1649_s29 }
 0xb8c   : > { %993 = vrot.lane.b32.xlu0 %v983_v25, %s1649_s29 }
 0xb8d   : > { %986 = vperm.xlu1 %1594, %v1465_v24  }
 0xbfa   : > { %v996_v26 = vpop.permute.xlu0 %995 }
 0xbfb   : > { %v1003_v27 = vsel %vm563_vm7, %v996_v26, 0  ;;  %v992_v28 = vpop.permute.xlu1 %991 }
 0xbfc   : > { %1546 = vmatpush3.bf16.msra.mxu0 %v1003_v27 }
 0xbfd   : > { %1547 = vmatprep.subr.bf16.mxu0 %v1646_v4 }
 0xbfe   : > { %v994_v29 = vpop.permute.xlu0 %993 }
 0xbff   : > { %v997_v30 = vsel %vm428_vm2, %v992_v28, %v994_v29  ;;  %v1612_v29 = vld [vmem:[%s1956_s10] sm:$0xff]  }
 0xc00   : > { %1548 = vmatpush3.bf16.msra.mxu0 %v997_v30 }
 0xc03   : > { %1550 = vmatmul.mubr.msk.bf16.vlgmr.msra.gmra.mxu0 %vm585_vm8, %v1464_v31 }
 0xc04   : > { %1570 = vmatprep.mubr.msk.bf16.mxu0 %vm585_vm8, %v1612_v29 }
 0xc08   : > { %v987_v32 = vpop.permute.xlu1 %986 }
 0xcc3   : > { %v1039_v33 = vpop.f32.mrf.mxu0 }
 0xcc4   : > { %v1040_v34 = vadd.f32 %v1039_v33, %v987_v32 }
 0xcc5   : > { %v1551_v35 = vpop.f32.mrf.mxu0 }
 0xcc6   : > { %v1049_v36 = vsel %vm420_vm0, %v1040_v34, 0.0  ;;  %v1052_v37 = vmul.f32 %v1040_v34, %v1040_v34  ;;  %v1279_v35 = vld [vmem:[%s1957_s11] sm:$0xff] }
 0xcc7   : > { %1050 = vadd.xlane.f32.xlu0 %v1049_v36  ;;  %v1042_v38 = vpop.f32.mrf.mxu0 }
 0xcc8   : > { %v1053_v39 = vsel %vm420_vm0, %v1052_v37, 0.0  ;;  %v1280_v37 = vld [vmem:[%s1957_s11 + $0x8] sm:$0xff]  ;;  %v1281_v38 = vld [vmem:[%s1957_s11 + $0x10] sm:$0xff] }
 0xcc9   : > { %1054 = vadd.xlane.f32.xlu1 %v1053_v39  ;;  %v1552_v40 = vpop.f32.mrf.mxu0  ;;  %v1282_v39 = vld [vmem:[%s1957_s11 + $0x18] sm:$0xff] }
 0xd50   : > { %v1051_v41 = vpop.xlane.xlu0 %1050 }
 0xd52   : > { %v1055_v42 = vpop.xlane.xlu1 %1054 }
 0xd53   : > { %v1056_v43 = vsel %vm428_vm2, %v1051_v41, %v1055_v42 }
 0xd54   : > { %v1057_v44 = vmul.f32 0.0625, %v1056_v43 }
 0xd56   : > { %1554 = vmatpush3.msra.mxu1 %v1057_v44 }
 0xd57   : > { %1556 = vmatmul.mubr.msk.f32.vlgmr.msra.gmra.mxu1 %vm431_vm3, %v1749_v9  ;;  %1558 = vmatprep.subr.bf16.mxu1 %v1646_v4 }
 0xd58   : > { %1562 = vmatprep.mubr.msk.bf16.mxu1 %vm1647_vm1, %v1646_v4 }
 0xe17   : > { %v1124_v46 = vpop.f32.mrf.mxu1 }
 0xe18   : > { %v1128_v47 = vmul.f32 %v1124_v46, %v1124_v46  ;;  %1136 = vperm.xlu1 %1594, %v1124_v46  }
 0xe19   : > { %v1557_v49 = vpop.f32.mrf.mxu1 }
 0xe1a   : > { %1130 = vrot.lane.b32.xlu0 %v1128_v47, %s1649_s29 }
 0xe1c   : > { %1150 = vperm.xlu1 %1594, %v1470_v48  }
 0xe8c   : > { %v1131_v50 = vpop.permute.xlu0 %1130 }
 0xe8d   : > { %v1133_v51 = vsub.f32 %v1124_v46, %v1131_v50  ;;  %v1613_v46 = vld [vmem:[%s1956_s10 + $0x8] sm:$0xff]  }
 0xe8f   : > { %v1140_v52 = vadd.f32 1e-05, %v1133_v51 }
 0xe91   : > { %1632 = vrsqrt.f32 %v1140_v52 }
 0xe93   : > { %v1137_v54 = vpop.permute.xlu1 %1136 }
 0xe94   : > { %v1139_v0 = vsub.f32 %v1040_v34, %v1137_v54 }
 0xe97   : > { %v1151_v57 = vpop.permute.xlu1 %1150 }
 0xe9e   : > { %v1633_v9 = vpop.eup %1632 }
 0xe9f   : > { %1144 = vperm.xlu0 %1595, %v1633_v9  }
 0xea3   : > { %1596 = vset.pattern.permute.xlu0 %v1648_v10 }
 0xea4   : > { %1156 = vperm.xlu0 %1596, %v1471_v53  }
 0xf1a   : > { %v1145_v55 = vpop.permute.xlu0 %1144 }
 0xf1b   : > { %v1147_v56 = vmul.f32 %v1145_v55, %v1139_v0 }
 0xf1d   : > { %v1153_v58 = vmul.f32 %v1151_v57, %v1147_v56 }
 0xf1f   : > { %v1157_v59 = vpop.permute.xlu0 %1156 }
 0xf20   : > { %v1159_v60 = vadd.f32 %v1157_v59, %v1153_v58 }
 0xf22   : > { %v1473_v61 = vmul.f32 -1.442695, %v1159_v60 }
 0xf24   : > { %1634 = vpow2.f32 %v1473_v61 }
 0xf31   : > { %v1635_v62 = vpop.eup %1634 }
 0xf32   : > { %v1163_v63 = vadd.f32 1.0, %v1635_v62 }
 0xf34   : > { %1636 = vrcp.f32 %v1163_v63 }
 0xf41   : > { %v1637_v1 = vpop.eup %1636 }
 0xf42   : > { %v1166_v2 = vmul.f32 %v1637_v1, %v1159_v60 }
 0xf44   : > { %v1171_v3 = vpack.c.bf16 %v1166_v2, %v1166_v2 }
 0xf46   : > { %1172 = vst.msk [vmem:[#allocation2 + $0x4] sm:$0xf] %vm547_vm6, %v1171_v3 }
 0xf4d   : > { %v1606_v10 = vld [vmem:[#allocation2 + $0x4] ss:$0 sps:$4 sm:$0xff]  }
 0xf4e   : > { %1185 = vrot.lane.b32.xlu1 %v1606_v10, %s1651_s16  ;;  %v1173_v6 = vld [vmem:[#allocation2] sm:$0xff] }
 0xf4f   : > { %v1477_v7 = vcombine.high %v1173_v6, %v1173_v6  ;;  %v1476_v8 = vcombine.low %v1173_v6, %v1173_v6 }
 0xf52   : > { %1183 = vrot.lane.b32.xlu1 %v1606_v10, %s1652_s17 }
 0xfc0   : > { %v1186_v5 = vpop.permute.xlu1 %1185 }
 0xfc1   : > { %1203 = vrot.lane.b32.xlu0 %v1186_v5, %s1649_s29 }
 0xfc4   : > { %v1184_v11 = vpop.permute.xlu1 %1183 }
 0xfc5   : > { %v1191_v12 = vsel %vm563_vm7, %v1477_v7, %v1184_v11  ;;  %v1189_v13 = vsel %vm563_vm7, %v1476_v8, %v1184_v11 }
 0xfc6   : > { %1201 = vrot.lane.b32.xlu0 %v1191_v12, %s1649_s29  ;;  %1199 = vrot.lane.b32.xlu1 %v1189_v13, %s1649_s29 }
 0xfca   : > { %1194 = vperm.xlu1 %1594, %v1475_v15  }
0x1033   : > { %v1204_v16 = vpop.permute.xlu0 %1203 }
0x1034   : > { %v1211_v17 = vsel %vm563_vm7, %v1204_v16, 0 }
0x1035   : > { %1559 = vmatpush3.bf16.msra.mxu1 %v1211_v17 }
0x1036   : > { %1560 = vmatprep.subr.bf16.mxu1 %v1646_v4 }
0x1038   : > { %v1202_v18 = vpop.permute.xlu0 %1201  ;;  %v1200_v14 = vpop.permute.xlu1 %1199 }
0x1039   : > { %v1205_v19 = vsel %vm428_vm2, %v1200_v14, %v1202_v18 }
0x103a   : > { %1561 = vmatpush3.bf16.msra.mxu1 %v1205_v19 }
0x103d   : > { %1563 = vmatmul.mubr.msk.bf16.vlgmr.msra.gmra.mxu1 %vm585_vm8, %v1474_v20 }
0x1045   : > { %v1195_v21 = vpop.permute.xlu1 %1194 }
0x10fd   : > { %v1247_v22 = vpop.f32.mrf.mxu1 }
0x10fe   : > { %v1248_v23 = vadd.f32 %v1247_v22, %v1195_v21 }
0x10ff   : > { %v1564_v24 = vpop.f32.mrf.mxu1 }
0x1100   : > { %v1253_v25 = vadd.f32 %v1248_v23, %v1830_v45 }
0x1101   : > { %v1250_v26 = vpop.f32.mrf.mxu1 }
0x1102   : > { %v1258_v27 = vpack.c.bf16 %v1253_v25, %v1253_v25 }
0x1103   : > { %v1565_v4 = vpop.f32.mrf.mxu1 }
0x1104   : > { %1259 = vst.msk [vmem:[#allocation2 + $0x4] sm:$0xf] %vm547_vm6, %v1258_v27 }
0x110b   : > { %v1609_v28 = vld [vmem:[#allocation2 + $0x4] ss:$0 sps:$4 sm:$0xff]  }
0x110c   : > { %1270 = vrot.lane.b32.xlu1 %v1609_v28, %s1652_s17  ;;  %1272 = vrot.lane.b32.xlu0 %v1609_v28, %s1651_s16  ;;  %v1260_v30 = vld [vmem:[#allocation2] sm:$0xff] }
0x110d   : > { %v1480_v31 = vcombine.low %v1260_v30, %v1260_v30  ;;  %v1481_v34 = vcombine.high %v1260_v30, %v1260_v30 }
0x117e   : > { %v1271_v32 = vpop.permute.xlu1 %1270  ;;  %v1273_v45 = vpop.permute.xlu0 %1272 }
0x117f   : > { %1319 = vrot.lane.b32.xlu0 %v1273_v45, %s1649_s29  ;;  %v1276_v33 = vsel %vm563_vm7, %v1480_v31, %v1271_v32  ;;  %v1278_v36 = vsel %vm563_vm7, %v1481_v34, %v1271_v32 }
0x1180   : > { %1315 = vrot.lane.b32.xlu1 %v1276_v33, %s1649_s29 }
0x1183   : > { %1317 = vrot.lane.b32.xlu0 %v1278_v36, %s1649_s29 }
0x1184   : > { %1285 = vperm.xlu1 %1594, %v1279_v35  }
0x1187   : > { %1290 = vperm.xlu0 %1596, %v1280_v37  }
0x1188   : > { %1295 = vperm.xlu1 %1594, %v1281_v38  }
0x118b   : > { %1300 = vperm.xlu0 %1596, %v1282_v39  }
0x11f1   : > { %v1320_v40 = vpop.permute.xlu0 %1319 }
0x11f2   : > { %v1330_v41 = vsel %vm563_vm7, %v1320_v40, 0  ;;  %1574 = vmatprep.subr.msk.bf16.mxu0 %vm563_vm7, %v1320_v40  ;;  %v1316_v42 = vpop.permute.xlu1 %1315 }
0x11f3   : > { %1567 = vmatpush3.bf16.msra.mxu0 %v1330_v41 }
0x11f5   : > { %v1318_v43 = vpop.permute.xlu0 %1317 }
0x11f6   : > { %v1321_v44 = vsel %vm428_vm2, %v1316_v42, %v1318_v43 }
0x11f7   : > { %1568 = vmatprep.subr.bf16.mxu0 %v1321_v44 }
0x11f8   : > { %1569 = vmatpush3.bf16.msra.mxu0 %v1321_v44 }
0x11fb   : > { %1571 = vmatmul.mubr.msk.bf16.vlgmr.msra.gmra.mxu0 %vm585_vm8, %v1613_v46 }
0x11ff   : > { %v1286_v47 = vpop.permute.xlu1 %1285 }
0x1202   : > { %v1291_v48 = vpop.permute.xlu0 %1290 }
0x1203   : > { %v1296_v49 = vpop.permute.xlu1 %1295 }
0x1206   : > { %v1301_v53 = vpop.permute.xlu0 %1300 }
0x12bb   : > { %v1572_v50 = vpop.f32.mrf.mxu0 }
0x12bc   : > { %v1375_v51 = vadd.f32 %v1572_v50, %v1296_v49 }
0x12bd   : > { %v1366_v52 = vpop.f32.mrf.mxu0 }
0x12be   : > { %1383 = vst.msk [vmem:[%s410_s19 + $0x10] sm:$0xff] %vm420_vm0, %v1375_v51  ;;  %v1367_v9 = vadd.f32 %v1366_v52, %v1286_v47 }
0x12bf   : > { %v1573_v54 = vpop.f32.mrf.mxu0 }
0x12c0   : > { %1381 = vst.msk [vmem:[%s410_s19] sm:$0xff] %vm420_vm0, %v1367_v9  ;;  %v1378_v0 = vadd.f32 %v1573_v54, %v1301_v53 }
0x12c1   : > { %v1369_v55 = vpop.f32.mrf.mxu0 }
0x12c2   : > { %1384 = vst.msk [vmem:[%s410_s19 + $0x18] sm:$0xff] %vm420_vm0, %v1378_v0  ;;  %v1370_v56 = vadd.f32 %v1369_v55, %v1291_v48 }
0x12c4   : > { %1382 = vst.msk [vmem:[%s410_s19 + $0x8] sm:$0xff] %vm420_vm0, %v1370_v56 }
0x12c5 PF: > { %s22_s21 = sadd.s32 1, %s1644_s21  }
0x12c6   : > { %p19_p4 = scmp.ge.s32.totalorder %s22_s21, 4  }
0x12c8   :  { %21 = sbr.rel (!%p19_p4) target bundleno = 1 (0x1), region = 106 }

</bundles_post_ra>
